<compile_context>
chip_gen: v7x
topology: tpu7x:2x2x1
jax: 0.10.0
libtpu: 0.0.40
codegen_flags: <defaults>
</compile_context>

<pallas_src>
import functools

import jax
import jax.numpy as jnp
from jax.experimental import pallas as pl
from jax.experimental.pallas import tpu as pltpu

C_PAD = 128  # lane width: every channel dimension is zero-padded to this


def _round_up(x, m):
    return ((x + m - 1) // m) * m


# ---------------------------------------------------------------------------
# One-time parameter preparation (hoisted weight re-layout + static geometry)
# ---------------------------------------------------------------------------
def prepare_tcn_params(conv_ws, conv_bs, fc_w, fc_b, *, input_dim, kernel_size, seq_len):
    """conv_ws[i]: (C_out, C_in, K) torch Conv1d layout; conv_bs[i]: (C_out,);
    fc_w: (num_classes, C_last); fc_b: (num_classes,)."""
    K = kernel_size
    pad = K - 1
    n_layers = len(conv_ws)
    assert n_layers >= 1

    dilations, l_outs = [], []
    L = seq_len
    for i in range(n_layers):
        d = 2 ** i
        dilations.append(d)
        L = L + 2 * pad - d * (K - 1)          # torch Conv1d output length (stride=1)
        assert L >= 1
        l_outs.append(L)

    pad_top = _round_up(max(pad, 1), 8)                          # zero halo above each slot's data
    l_win = _round_up(max(max(l_outs) + pad, seq_len), 8)        # uniform 8-aligned output window
    l_slot = _round_up(pad_top + (K - 1) * max(dilations) + l_win, 8)

    # Conv weights: taps stacked along the contraction axis, channels padded to C_PAD,
    # all layers stacked into a single array (fewer input streams).
    w_all = jnp.zeros((n_layers, K * C_PAD, C_PAD), jnp.float32)
    b_all = jnp.zeros((n_layers, 1, C_PAD), jnp.float32)
    for i, (w, b) in enumerate(zip(conv_ws, conv_bs)):
        c_out, c_in, k = w.shape
        assert k == K and c_in <= C_PAD and c_out <= C_PAD
        for kk in range(K):
            w_all = w_all.at[i, kk * C_PAD:kk * C_PAD + c_in, :c_out].set(
                jnp.transpose(w[:, :, kk]).astype(jnp.float32))
        b_all = b_all.at[i, 0, :c_out].set(b.astype(jnp.float32))

    num_classes, c_last = fc_w.shape
    fc_w_p = jnp.zeros((C_PAD, num_classes), jnp.float32).at[:c_last, :].set(
        jnp.transpose(fc_w).astype(jnp.float32))
    fc_b_p = fc_b.reshape(1, num_classes).astype(jnp.float32)

    params = dict(w_all=w_all, b_all=b_all, fc_w=fc_w_p, fc_b=fc_b_p)
    cfg = dict(K=K, pad=pad, n_layers=n_layers, dilations=tuple(dilations),
               l_outs=tuple(l_outs), pad_top=pad_top, l_win=l_win, l_slot=l_slot,
               seq_len=seq_len, input_dim=input_dim, num_classes=num_classes)
    return params, cfg


# ---------------------------------------------------------------------------
# Fused kernel: input slotting + all conv layers + ReLU + mean-pool + FC,
# with every intermediate activation staying in VMEM scratch.
# ---------------------------------------------------------------------------
def _tcn_kernel(x_ref, w_ref, b_ref, fcw_ref, fcb_ref, out_ref, *scratch,
                cfg, b_tile):
    n_layers = cfg["n_layers"]
    K, pad = cfg["K"], cfg["pad"]
    pad_top, l_win = cfg["pad_top"], cfg["l_win"]
    dils, l_outs = cfg["dilations"], cfg["l_outs"]
    L, c_in = cfg["seq_len"], cfg["input_dim"]

    # Zero the ping-pong activation slots: the zero halo rows/lanes double as the
    # conv's implicit zero padding.
    for s in scratch:
        s[...] = jnp.zeros_like(s)

    # Slot the raw input in-kernel: rows [pad_top, pad_top+L) x lanes [0, c_in) carry
    # data; everything else stays zero.  (No wrapper-side jnp.pad per call.)
    scratch[0][:, pad_top:pad_top + L, :c_in] = x_ref[...]

    m_rows = b_tile * l_win
    # Local time index of every output-window row (hoisted out of the layer loop).
    t_idx = jax.lax.broadcasted_iota(jnp.int32, (b_tile, l_win, C_PAD), 1)

    src = scratch[0]
    for i in range(n_layers):
        d = dils[i]

        # K dilation-shifted views of the source slot (static ref slices), folded into the
        # contraction of a single tall-skinny 2D MXU matmul.
        taps = []
        for k in range(K):
            start = pad_top - pad + k * d                       # static Python int, >= 0
            taps.append(src[:, start:start + l_win, :].reshape(m_rows, C_PAD))
        xcat = jnp.concatenate(taps, axis=1)                    # (m_rows, K*C_PAD)

        y = jnp.dot(xcat, w_ref[i], preferred_element_type=jnp.float32)
        y = jnp.maximum(y + b_ref[i], 0.0)                      # bias + ReLU in f32
        # Zero rows past this layer's true output length (restores the zero halo).
        y3 = jnp.where(t_idx < l_outs[i], y.reshape(b_tile, l_win, C_PAD), 0.0)

        if i + 1 < n_layers:
            dst = scratch[(i + 1) % 2]
            dst[:, pad_top:pad_top + l_win, :] = y3             # aligned, lane-dense store
            src = dst
        else:
            # Fused mean-pool (masked rows are already zero) + FC epilogue.
            pooled = jnp.sum(y3, axis=1) * (1.0 / l_outs[i])    # (b_tile, C_PAD)
            logits = jnp.dot(pooled, fcw_ref[...],
                             preferred_element_type=jnp.float32) + fcb_ref[...]
            out_ref[...] = logits.astype(out_ref.dtype)


# ---------------------------------------------------------------------------
# Wrapper: the whole forward is exactly one pallas_call.
# ---------------------------------------------------------------------------
def tcn_forward(x, params, cfg):
    """x: (B, seq_len, input_dim) -- same input as the torch module's forward."""
    B, L, C_in = x.shape
    assert L == cfg["seq_len"] and C_in == cfg["input_dim"]
    n_layers = cfg["n_layers"]
    l_slot = cfg["l_slot"]
    num_classes = cfg["num_classes"]

    b_tile = max(d for d in (8, 4, 2, 1) if B % d == 0)
    grid = (B // b_tile,)

    w_all, b_all = params["w_all"], params["b_all"]
    fc_w, fc_b = params["fc_w"], params["fc_b"]

    in_specs = [
        pl.BlockSpec((b_tile, L, C_in), lambda b: (b, 0, 0)),
        # Weights: full-array blocks with constant index maps (stay VMEM-resident).
        pl.BlockSpec(w_all.shape, lambda b: (0, 0, 0)),
        pl.BlockSpec(b_all.shape, lambda b: (0, 0, 0)),
        pl.BlockSpec(fc_w.shape, lambda b: (0, 0)),
        pl.BlockSpec(fc_b.shape, lambda b: (0, 0)),
    ]

    n_scratch = 1 if n_layers == 1 else 2
    kernel = functools.partial(_tcn_kernel, cfg=cfg, b_tile=b_tile)

    return pl.pallas_call(
        kernel,
        out_shape=jax.ShapeDtypeStruct((B, num_classes), jnp.float32),
        grid=grid,
        in_specs=in_specs,
        out_specs=pl.BlockSpec((b_tile, num_classes), lambda b: (b, 0)),
        scratch_shapes=[pltpu.VMEM((b_tile, l_slot, C_PAD), jnp.float32)
                        for _ in range(n_scratch)],
        compiler_params=pltpu.CompilerParams(dimension_semantics=("parallel",)),
    )(x.astype(jnp.float32), w_all, b_all, fc_w, fc_b)


# ---------------------------------------------------------------------------
# Pure-JAX reference (mirrors the torch module) for a numerical sanity check
# ---------------------------------------------------------------------------
def reference_forward(x, conv_ws, conv_bs, fc_w, fc_b, kernel_size=2):
    h = x.astype(jnp.float32)
    K = kernel_size
    pad = K - 1
    for i, (w, b) in enumerate(zip(conv_ws, conv_bs)):
        d = 2 ** i
        Bb, L, _ = h.shape
        hp = jnp.pad(h, ((0, 0), (pad, pad), (0, 0)))
        L_out = L + 2 * pad - d * (K - 1)
        acc = b[None, None, :].astype(jnp.float32)
        for k in range(K):
            acc = acc + jnp.einsum("blc,oc->blo",
                                   hp[:, k * d:k * d + L_out, :],
                                   w[:, :, k].astype(jnp.float32))
        h = jnp.maximum(acc, 0.0)
    return h.mean(axis=1) @ fc_w.T.astype(jnp.float32) + fc_b[None, :].astype(jnp.float32)


# ---------------------------------------------------------------------------
if __name__ == "__main__":
    batch, seq_len, input_dim = 2, 16, 8
    num_channels = (16, 32)
    num_classes = 4
    kernel_size = 2

    key = jax.random.PRNGKey(0)
    keys = jax.random.split(key, 2 * len(num_channels) + 3)

    conv_ws, conv_bs = [], []
    in_ch = input_dim
    for i, out_ch in enumerate(num_channels):
        conv_ws.append(0.1 * jax.random.normal(keys[2 * i], (out_ch, in_ch, kernel_size),
                                               jnp.float32))
        conv_bs.append(0.1 * jax.random.normal(keys[2 * i + 1], (out_ch,), jnp.float32))
        in_ch = out_ch
    fc_w = 0.1 * jax.random.normal(keys[-3], (num_classes, num_channels[-1]), jnp.float32)
    fc_b = 0.1 * jax.random.normal(keys[-2], (num_classes,), jnp.float32)
    x = jax.random.normal(keys[-1], (batch, seq_len, input_dim), jnp.float32)

    params, cfg = prepare_tcn_params(conv_ws, conv_bs, fc_w, fc_b,
                                     input_dim=input_dim, kernel_size=kernel_size,
                                     seq_len=seq_len)

    out = tcn_forward(x, params, cfg)
    out = jax.block_until_ready(out)

    ref = reference_forward(x, conv_ws, conv_bs, fc_w, fc_b, kernel_size)
    assert out.shape == (batch, num_classes), out.shape
    assert jnp.allclose(out, ref, atol=1e-4, rtol=1e-4), (out, ref)

    print("KERNEL_OK")
</pallas_src>

<mosaic_0001>
module attributes {stable_mosaic.version = 11 : i64} {
  func.func @_tcn_kernel(%arg0: i32, %arg1: memref<2x16x8xf32, #tpu.memory_space<vmem>>, %arg2: memref<2x256x128xf32, #tpu.memory_space<vmem>>, %arg3: memref<2x1x128xf32, #tpu.memory_space<vmem>>, %arg4: memref<128x4xf32, #tpu.memory_space<vmem>>, %arg5: memref<1x4xf32, #tpu.memory_space<vmem>>, %arg6: memref<2x4xf32, #tpu.memory_space<vmem>>, %arg7: memref<2x40x128xf32, #tpu.memory_space<vmem>>, %arg8: memref<2x40x128xf32, #tpu.memory_space<vmem>>) attributes {dimension_semantics = [#tpu.dimension_semantics<parallel>], iteration_bounds = array<i64: 1>, scalar_prefetch = 0 : i64, scratch_operands = 2 : i64, tpu.core_type = #tpu.core_type<tc>, window_params = [{transform_indices = @transform_0, window_bounds = array<i64: 2, 16, 8>}, {pipeline_mode = #tpu.pipeline_mode<synchronous>, transform_indices = @transform_1, window_bounds = array<i64: 2, 256, 128>}, {pipeline_mode = #tpu.pipeline_mode<synchronous>, transform_indices = @transform_2, window_bounds = array<i64: 2, 1, 128>}, {pipeline_mode = #tpu.pipeline_mode<synchronous>, transform_indices = @transform_3, window_bounds = array<i64: 128, 4>}, {pipeline_mode = #tpu.pipeline_mode<synchronous>, transform_indices = @transform_4, window_bounds = array<i64: 1, 4>}, {transform_indices = @transform_5, window_bounds = array<i64: 2, 4>}]} {
    %cst = arith.constant 0.000000e+00 : f32
    %0 = vector.broadcast %cst : f32 to vector<2x40x128xf32>
    %c0 = arith.constant 0 : index
    %c0_0 = arith.constant 0 : index
    %c0_1 = arith.constant 0 : index
    %1 = vector.load %arg7[%c0, %c0_0, %c0_1] : memref<2x40x128xf32, #tpu.memory_space<vmem>>, vector<2x40x128xf32>
    tpu.vector_store %arg7[%c0, %c0_0, %c0_1], %0 {strides = array<i32>} : memref<2x40x128xf32, #tpu.memory_space<vmem>>, vector<2x40x128xf32>,
    %cst_2 = arith.constant 0.000000e+00 : f32
    %2 = vector.broadcast %cst_2 : f32 to vector<2x40x128xf32>
    %c0_3 = arith.constant 0 : index
    %c0_4 = arith.constant 0 : index
    %c0_5 = arith.constant 0 : index
    %3 = vector.load %arg8[%c0_3, %c0_4, %c0_5] : memref<2x40x128xf32, #tpu.memory_space<vmem>>, vector<2x40x128xf32>
    tpu.vector_store %arg8[%c0_3, %c0_4, %c0_5], %2 {strides = array<i32>} : memref<2x40x128xf32, #tpu.memory_space<vmem>>, vector<2x40x128xf32>,
    %c0_6 = arith.constant 0 : index
    %c0_7 = arith.constant 0 : index
    %c0_8 = arith.constant 0 : index
    %4 = vector.load %arg1[%c0_6, %c0_7, %c0_8] : memref<2x16x8xf32, #tpu.memory_space<vmem>>, vector<2x16x8xf32>
    %c0_9 = arith.constant 0 : index
    %c8 = arith.constant 8 : index
    %c0_10 = arith.constant 0 : index
    %5 = vector.load %arg7[%c0_9, %c8, %c0_10] : memref<2x40x128xf32, #tpu.memory_space<vmem>>, vector<2x16x8xf32>
    tpu.vector_store %arg7[%c0_9, %c8, %c0_10], %4 {strides = array<i32>} : memref<2x40x128xf32, #tpu.memory_space<vmem>>, vector<2x16x8xf32>,
    %6 = tpu.iota {dimensions = array<i32: 1>} : vector<2x24x128xi32>
    %c0_11 = arith.constant 0 : index
    %c7 = arith.constant 7 : index
    %c0_12 = arith.constant 0 : index
    %7 = vector.load %arg7[%c0_11, %c7, %c0_12] : memref<2x40x128xf32, #tpu.memory_space<vmem>>, vector<2x24x128xf32>
    %8 = vector.shape_cast %7 : vector<2x24x128xf32> to vector<48x128xf32>
    %c0_13 = arith.constant 0 : index
    %c8_14 = arith.constant 8 : index
    %c0_15 = arith.constant 0 : index
    %9 = vector.load %arg7[%c0_13, %c8_14, %c0_15] : memref<2x40x128xf32, #tpu.memory_space<vmem>>, vector<2x24x128xf32>
    %10 = vector.shape_cast %9 : vector<2x24x128xf32> to vector<48x128xf32>
    %11 = tpu.concatenate %8, %10 in 1 : vector<48x128xf32>, vector<48x128xf32> -> vector<48x256xf32>
    %c0_16 = arith.constant 0 : index
    %c0_17 = arith.constant 0 : index
    %c0_18 = arith.constant 0 : index
    %12 = vector.load %arg2[%c0_16, %c0_17, %c0_18] : memref<2x256x128xf32, #tpu.memory_space<vmem>>, vector<1x256x128xf32>
    %13 = vector.shape_cast %12 : vector<1x256x128xf32> to vector<256x128xf32>
    %cst_19 = arith.constant dense<0.000000e+00> : vector<48x128xf32>
    %14 = tpu.matmul %11, %13, %cst_19 {dimension_numbers = #tpu.dot_dimension_numbers<[1], [0], [0], [1], [0, 0, 1, 1], [], []>} : vector<48x256xf32>, vector<256x128xf32>, vector<48x128xf32> -> vector<48x128xf32>
    %c0_20 = arith.constant 0 : index
    %c0_21 = arith.constant 0 : index
    %c0_22 = arith.constant 0 : index
    %15 = vector.load %arg3[%c0_20, %c0_21, %c0_22] : memref<2x1x128xf32, #tpu.memory_space<vmem>>, vector<1x1x128xf32>
    %16 = vector.shape_cast %15 : vector<1x1x128xf32> to vector<1x128xf32>
    %17 = vector.broadcast %16 : vector<1x128xf32> to vector<48x128xf32>
    %18 = arith.addf %14, %17 : vector<48x128xf32>
    %cst_23 = arith.constant 0.000000e+00 : f32
    %19 = vector.broadcast %cst_23 : f32 to vector<48x128xf32>
    %20 = arith.maximumf %18, %19 : vector<48x128xf32>
    %c17_i32 = arith.constant 17 : i32
    %21 = vector.broadcast %c17_i32 : i32 to vector<2x24x128xi32>
    %22 = arith.cmpi slt, %6, %21 : vector<2x24x128xi32>
    %23 = vector.shape_cast %20 : vector<48x128xf32> to vector<2x24x128xf32>
    %cst_24 = arith.constant 0.000000e+00 : f32
    %24 = vector.broadcast %cst_24 : f32 to vector<2x24x128xf32>
    %25 = arith.select %22, %23, %24 : vector<2x24x128xi1>, vector<2x24x128xf32>
    %c0_25 = arith.constant 0 : index
    %c8_26 = arith.constant 8 : index
    %c0_27 = arith.constant 0 : index
    %26 = vector.load %arg8[%c0_25, %c8_26, %c0_27] : memref<2x40x128xf32, #tpu.memory_space<vmem>>, vector<2x24x128xf32>
    tpu.vector_store %arg8[%c0_25, %c8_26, %c0_27], %25 {strides = array<i32>} : memref<2x40x128xf32, #tpu.memory_space<vmem>>, vector<2x24x128xf32>,
    %c0_28 = arith.constant 0 : index
    %c7_29 = arith.constant 7 : index
    %c0_30 = arith.constant 0 : index
    %27 = vector.load %arg8[%c0_28, %c7_29, %c0_30] : memref<2x40x128xf32, #tpu.memory_space<vmem>>, vector<2x24x128xf32>
    %28 = vector.shape_cast %27 : vector<2x24x128xf32> to vector<48x128xf32>
    %c0_31 = arith.constant 0 : index
    %c9 = arith.constant 9 : index
    %c0_32 = arith.constant 0 : index
    %29 = vector.load %arg8[%c0_31, %c9, %c0_32] : memref<2x40x128xf32, #tpu.memory_space<vmem>>, vector<2x24x128xf32>
    %30 = vector.shape_cast %29 : vector<2x24x128xf32> to vector<48x128xf32>
    %31 = tpu.concatenate %28, %30 in 1 : vector<48x128xf32>, vector<48x128xf32> -> vector<48x256xf32>
    %c1 = arith.constant 1 : index
    %c0_33 = arith.constant 0 : index
    %c0_34 = arith.constant 0 : index
    %32 = vector.load %arg2[%c1, %c0_33, %c0_34] : memref<2x256x128xf32, #tpu.memory_space<vmem>>, vector<1x256x128xf32>
    %33 = vector.shape_cast %32 : vector<1x256x128xf32> to vector<256x128xf32>
    %cst_35 = arith.constant dense<0.000000e+00> : vector<48x128xf32>
    %34 = tpu.matmul %31, %33, %cst_35 {dimension_numbers = #tpu.dot_dimension_numbers<[1], [0], [0], [1], [0, 0, 1, 1], [], []>} : vector<48x256xf32>, vector<256x128xf32>, vector<48x128xf32> -> vector<48x128xf32>
    %c1_36 = arith.constant 1 : index
    %c0_37 = arith.constant 0 : index
    %c0_38 = arith.constant 0 : index
    %35 = vector.load %arg3[%c1_36, %c0_37, %c0_38] : memref<2x1x128xf32, #tpu.memory_space<vmem>>, vector<1x1x128xf32>
    %36 = vector.shape_cast %35 : vector<1x1x128xf32> to vector<1x128xf32>
    %37 = vector.broadcast %36 : vector<1x128xf32> to vector<48x128xf32>
    %38 = arith.addf %34, %37 : vector<48x128xf32>
    %cst_39 = arith.constant 0.000000e+00 : f32
    %39 = vector.broadcast %cst_39 : f32 to vector<48x128xf32>
    %40 = arith.maximumf %38, %39 : vector<48x128xf32>
    %c17_i32_40 = arith.constant 17 : i32
    %41 = vector.broadcast %c17_i32_40 : i32 to vector<2x24x128xi32>
    %42 = arith.cmpi slt, %6, %41 : vector<2x24x128xi32>
    %43 = vector.shape_cast %40 : vector<48x128xf32> to vector<2x24x128xf32>
    %cst_41 = arith.constant 0.000000e+00 : f32
    %44 = vector.broadcast %cst_41 : f32 to vector<2x24x128xf32>
    %45 = arith.select %42, %43, %44 : vector<2x24x128xi1>, vector<2x24x128xf32>
    %cst_42 = arith.constant dense<0.000000e+00> : vector<2x128xf32>
    %46 = vector.multi_reduction <add>, %45, %cst_42 [1] : vector<2x24x128xf32> to vector<2x128xf32>
    %cst_43 = arith.constant 0.0588235296 : f32
    %47 = vector.broadcast %cst_43 : f32 to vector<2x128xf32>
    %48 = arith.mulf %46, %47 : vector<2x128xf32>
    %c0_44 = arith.constant 0 : index
    %c0_45 = arith.constant 0 : index
    %49 = vector.load %arg4[%c0_44, %c0_45] : memref<128x4xf32, #tpu.memory_space<vmem>>, vector<128x4xf32>
    %cst_46 = arith.constant dense<0.000000e+00> : vector<2x4xf32>
    %50 = tpu.matmul %48, %49, %cst_46 {dimension_numbers = #tpu.dot_dimension_numbers<[1], [0], [0], [1], [0, 0, 1, 1], [], []>} : vector<2x128xf32>, vector<128x4xf32>, vector<2x4xf32> -> vector<2x4xf32>
    %c0_47 = arith.constant 0 : index
    %c0_48 = arith.constant 0 : index
    %51 = vector.load %arg5[%c0_47, %c0_48] : memref<1x4xf32, #tpu.memory_space<vmem>>, vector<1x4xf32>
    %52 = vector.broadcast %51 : vector<1x4xf32> to vector<2x4xf32>
    %53 = arith.addf %50, %52 : vector<2x4xf32>
    %c0_49 = arith.constant 0 : index
    %c0_50 = arith.constant 0 : index
    %54 = vector.load %arg6[%c0_49, %c0_50] : memref<2x4xf32, #tpu.memory_space<vmem>>, vector<2x4xf32>
    tpu.vector_store %arg6[%c0_49, %c0_50], %53 {strides = array<i32>} : memref<2x4xf32, #tpu.memory_space<vmem>>, vector<2x4xf32>,
    return
  }
  func.func @transform_0(%arg0: i32) -> (i32, i32, i32) {
    %c0_i32 = arith.constant 0 : i32
    %c0_i32_0 = arith.constant 0 : i32
    %c0_i32_1 = arith.constant 0 : i32
    return %arg0, %c0_i32, %c0_i32_0 : i32, i32, i32
  }
  func.func @transform_1(%arg0: i32) -> (i32, i32, i32) {
    %c0_i32 = arith.constant 0 : i32
    %c0_i32_0 = arith.constant 0 : i32
    %c0_i32_1 = arith.constant 0 : i32
    %c0_i32_2 = arith.constant 0 : i32
    return %c0_i32, %c0_i32_0, %c0_i32_1 : i32, i32, i32
  }
  func.func @transform_2(%arg0: i32) -> (i32, i32, i32) {
    %c0_i32 = arith.constant 0 : i32
    %c0_i32_0 = arith.constant 0 : i32
    %c0_i32_1 = arith.constant 0 : i32
    %c0_i32_2 = arith.constant 0 : i32
    return %c0_i32, %c0_i32_0, %c0_i32_1 : i32, i32, i32
  }
  func.func @transform_3(%arg0: i32) -> (i32, i32) {
    %c0_i32 = arith.constant 0 : i32
    %c0_i32_0 = arith.constant 0 : i32
    %c0_i32_1 = arith.constant 0 : i32
    return %c0_i32, %c0_i32_0 : i32, i32
  }
  func.func @transform_4(%arg0: i32) -> (i32, i32) {
    %c0_i32 = arith.constant 0 : i32
    %c0_i32_0 = arith.constant 0 : i32
    %c0_i32_1 = arith.constant 0 : i32
    return %c0_i32, %c0_i32_0 : i32, i32
  }
  func.func @transform_5(%arg0: i32) -> (i32, i32) {
    %c0_i32 = arith.constant 0 : i32
    %c0_i32_0 = arith.constant 0 : i32
    return %arg0, %c0_i32 : i32, i32
  }
}

</mosaic_0001>

<bundles_post_ra>
// kernel: tpu_custom_call.1
= control target key start
LH: loop header
LB: loop body
LE: loop exit
PB: predicated region body
PF: predicated region fallthrough
CT: control target
= control target key end

     0   :  { %10 = vsyncpa [#allocation5], 0  ;;  %s987_s0 = inlined_call_operand.vmem [shape: f32[2,16,8], index: 0, kind: input, shape index: {}]   ;;  %s988_s1 = inlined_call_operand.hbm [shape: f32[2,256,128], index: 1, kind: input, shape index: {}]   ;;  %s989_s2 = inlined_call_operand.vmem [shape: f32[2,1,128], index: 2, kind: input, shape index: {}]   ;;  %s990_s3 = inlined_call_operand.vmem [shape: f32[128,4], index: 3, kind: input, shape index: {}]   ;;  %s991_s4 = inlined_call_operand.vmem [shape: f32[1,4], index: 4, kind: input, shape index: {}]   ;;  %s992_s5 = inlined_call_operand.hbm [shape: f32[2,4], index: 5, kind: output, shape index: {}]  }
   0x1   :  { %11 = vsyncpa [#allocation6], 0  ;;  %s827_s18 = smov [#allocation4]   ;;  %s779_s22 = scalar_lea.hbm %s988_s1, 8192 }
   0x2   :  { %s19_s19 = sshll.u32 %s827_s18, 4  ;;  %p780_p0 = scmp.ne.s32.totalorder %s988_s1, %s779_s22  ;;  %s20_s19 = int_to_ptr.vmem [resolvable:$true] %s19_s19 }
   0x3   :  { %p783_p1 = scmp.lt.u32.totalorder %s779_s22, %s988_s1 }
   0x5   :  { %p785_p2 = pnand %p783_p1, %p780_p0 }
   0x7   :  { %788 = shalt.err (!%p785_p2)
}
   0x8   :  { %s789_s27 = scalar_lea.vmem %s20_s19, 8192  ;;  %p794_p4 = scmp.lt.s32.totalorder %s20_s19, %s20_s19 }
   0x9   :  { %p790_p3 = scmp.ne.s32.totalorder %s20_s19, %s789_s27  ;;  %p795_p5 = scmp.lt.s32.totalorder %s789_s27, %s789_s27 }
   0xb   :  { %p796_p6 = por %p795_p5, %p794_p4 }
   0xd   :  { %p797_p7 = pnand %p796_p6, %p790_p3 }
   0xf   :  { %800 = shalt.err (!%p797_p7)
}
  0x10   :  { %s828_s28 = smov 128   ;;  %s829_s29 = smov 8  }
  0x11   :  { %25 = dma.hbm_to_vmem [thread:$0]  %s988_s1, 8192, %s20_s19, [#allocation5], %s828_s28, %s828_s28, %s829_s29  }
  0x12   :  { %823 = dma.done.wait [#allocation5], 8192  }
  0x13   :  { %824 = vsyncadd [#allocation5], 4294959104  ;;  %v830_v0 = vmov 0.0   ;;  %v96_v1 = vld [vmem:[#allocation4 + $0x80] sm:$0xff]  ;;  %v97_v2 = vld [vmem:[#allocation4 + $0x88] sm:$0xff]  ;;  %vm59_vm0 = vcmask 64512  }
  0x14   :  { %36 = vst [vmem:[#allocation2 + $0x8] sm:$0xff] %v830_v0  ;;  %35 = vst [vmem:[#allocation2] sm:$0xff] %v830_v0  ;;  %v80_v3 = vld [vmem:[#allocation4] sm:$0xff]  ;;  %v684_v4 = vpack.c.bf16 %v97_v2, %v96_v1  ;;  %v81_v5 = vld [vmem:[#allocation4 + $0x8] sm:$0xff]  ;;  %vm832_vm2 = vmmov 0   ;;  %vm438_vm3 = vcmask 1041409  }
  0x15   :  { %37 = vst [vmem:[#allocation2 + $0x10] sm:$0xff] %v830_v0  ;;  %38 = vst [vmem:[#allocation2 + $0x18] sm:$0xff] %v830_v0  ;;  %v98_v6 = vld [vmem:[#allocation4 + $0x90] sm:$0xff]  ;;  %v99_v7 = vld [vmem:[#allocation4 + $0x98] sm:$0xff]  ;;  %v686_v8 = vpack.c.bf16 %v81_v5, %v80_v3  ;;  %s833_s22 = smov [#allocation7]   ;;  %vm511_vm4 = vcmask 25600  }
  0x16   :  { %40 = vst [vmem:[#allocation2 + $0x28] sm:$0xff] %v830_v0  ;;  %41 = vst [vmem:[#allocation2 + $0x30] sm:$0xff] %v830_v0  ;;  %v688_v9 = vpack.c.bf16 %v99_v7, %v98_v6  ;;  %v82_v10 = vld [vmem:[#allocation4 + $0x10] sm:$0xff]  ;;  %v83_v11 = vld [vmem:[#allocation4 + $0x18] sm:$0xff]  ;;  %685 = vmatprep.subr.bf16.mxu0 %v684_v4  ;;  %s519_s23 = sshll.u32 %s833_s22, 4  ;;  %s520_s23 = int_to_ptr.vmem [resolvable:$true] %s519_s23 }
  0x17   :  { %42 = vst [vmem:[#allocation2 + $0x38] sm:$0xff] %v830_v0  ;;  %43 = vst [vmem:[#allocation2 + $0x40] sm:$0xff] %v830_v0  ;;  %v100_v12 = vld [vmem:[#allocation4 + $0xa0] sm:$0xff]  ;;  %v101_v13 = vld [vmem:[#allocation4 + $0xa8] sm:$0xff]  ;;  %687 = vmatpush3.bf16.msra.mxu0 %v686_v8  ;;  %v690_v14 = vpack.c.bf16 %v83_v11, %v82_v10  ;;  %s801_s24 = scalar_lea.vmem %s520_s23, 32  ;;  %p806_p9 = scmp.lt.s32.totalorder %s520_s23, %s520_s23 }
  0x18   :  { %45 = vst [vmem:[#allocation3] sm:$0xff] %v830_v0  ;;  %49 = vst [vmem:[#allocation3 + $0x20] sm:$0xff] %v830_v0  ;;  %689 = vmatprep.subr.bf16.mxu0 %v688_v9  ;;  %v692_v15 = vpack.c.bf16 %v101_v13, %v100_v12  ;;  %v84_v16 = vld [vmem:[#allocation4 + $0x20] sm:$0xff]  ;;  %v85_v17 = vld [vmem:[#allocation4 + $0x28] sm:$0xff]  ;;  %p802_p8 = scmp.ne.s32.totalorder %s520_s23, %s801_s24  ;;  %p807_p10 = scmp.lt.s32.totalorder %s801_s24, %s801_s24 }
  0x19   :  { %50 = vst [vmem:[#allocation3 + $0x28] sm:$0xff] %v830_v0  ;;  %54 = vst [vmem:[#allocation3 + $0x48] sm:$0xff] %v830_v0  ;;  %v102_v18 = vld [vmem:[#allocation4 + $0xb0] sm:$0xff]  ;;  %v103_v19 = vld [vmem:[#allocation4 + $0xb8] sm:$0xff]  ;;  %v694_v20 = vpack.c.bf16 %v85_v17, %v84_v16 }
  0x1a   :  { %v696_v21 = vpack.c.bf16 %v103_v19, %v102_v18  ;;  %v86_v22 = vld [vmem:[#allocation4 + $0x30] sm:$0xff]  ;;  %v87_v23 = vld [vmem:[#allocation4 + $0x38] sm:$0xff]  ;;  %v104_v24 = vld [vmem:[#allocation4 + $0xc0] sm:$0xff]  ;;  %p808_p11 = por %p807_p10, %p806_p9 }
  0x1b   :  { %691 = vmatpush3.bf16.msra.mxu0 %v690_v14  ;;  %v105_v25 = vld [vmem:[#allocation4 + $0xc8] sm:$0xff]  ;;  %v55_v26 = vld [vmem:[%s987_s0] sm:$0xff]  ;;  %v57_v30 = vld [vmem:[%s987_s0 + $0x10] sm:$0xff]  ;;  %v698_v32 = vpack.c.bf16 %v87_v23, %v86_v22 }
  0x1c   :  { %693 = vmatprep.subr.bf16.mxu0 %v692_v15  ;;  %v88_v27 = vld [vmem:[#allocation4 + $0x40] sm:$0xff]  ;;  %v89_v28 = vld [vmem:[#allocation4 + $0x48] sm:$0xff]  ;;  %60 = vst.msk [vmem:[#allocation2 + $0x8] sm:$0xff] %vm59_vm0, %v55_v26  ;;  %v58_v31 = vld [vmem:[%s987_s0 + $0x18] sm:$0xff]  ;;  %v700_v38 = vpack.c.bf16 %v105_v25, %v104_v24  ;;  %p809_p12 = pnand %p808_p11, %p802_p8 }
  0x1d   :  { %v56_v29 = vld [vmem:[%s987_s0 + $0x8] sm:$0xff]  ;;  %v106_v33 = vld [vmem:[#allocation4 + $0xd0] sm:$0xff]  ;;  %v107_v34 = vld [vmem:[#allocation4 + $0xd8] sm:$0xff]  ;;  %62 = vst.msk [vmem:[#allocation2 + $0x30] sm:$0xff] %vm59_vm0, %v57_v30  ;;  %v702_v49 = vpack.c.bf16 %v89_v28, %v88_v27 }
  0x1e   :  { %61 = vst.msk [vmem:[#allocation2 + $0x10] sm:$0xff] %vm59_vm0, %v56_v29  ;;  %63 = vst.msk [vmem:[#allocation2 + $0x38] sm:$0xff] %vm59_vm0, %v58_v31  ;;  %v264_v35 = vld [vmem:[#allocation4 + $0x180] sm:$0xff]  ;;  %v265_v36 = vld [vmem:[#allocation4 + $0x188] sm:$0xff]  ;;  %v704_v52 = vpack.c.bf16 %v107_v34, %v106_v33 }
  0x1f   :  { %695 = vmatpush3.bf16.msra.mxu0 %v694_v20  ;;  %v248_v37 = vld [vmem:[#allocation4 + $0x100] sm:$0xff]  ;;  %v716_v39 = vpack.c.bf16 %v265_v36, %v264_v35  ;;  %v249_v40 = vld [vmem:[#allocation4 + $0x108] sm:$0xff]  ;;  %v266_v41 = vld [vmem:[#allocation4 + $0x190] sm:$0xff] }
  0x20   :  { %697 = vmatprep.subr.bf16.mxu0 %v696_v21  ;;  %v267_v42 = vld [vmem:[#allocation4 + $0x198] sm:$0xff]  ;;  %v718_v43 = vpack.c.bf16 %v249_v40, %v248_v37  ;;  %v250_v45 = vld [vmem:[#allocation4 + $0x110] sm:$0xff]  ;;  %v268_v47 = vld [vmem:[#allocation4 + $0x1a0] sm:$0xff] }
  0x21   :  { %v720_v44 = vpack.c.bf16 %v267_v42, %v266_v41  ;;  %v251_v46 = vld [vmem:[#allocation4 + $0x118] sm:$0xff]  ;;  %717 = vmatprep.subr.bf16.mxu1 %v716_v39  ;;  %v269_v48 = vld [vmem:[#allocation4 + $0x1a8] sm:$0xff]  ;;  %v90_v50 = vld [vmem:[#allocation4 + $0x50] sm:$0xff] }
  0x22   :  { %719 = vmatpush3.bf16.msra.mxu1 %v718_v43  ;;  %v722_v51 = vpack.c.bf16 %v251_v46, %v250_v45  ;;  %v91_v53 = vld [vmem:[#allocation4 + $0x58] sm:$0xff]  ;;  %v724_v54 = vpack.c.bf16 %v269_v48, %v268_v47  ;;  %v252_v55 = vld [vmem:[#allocation4 + $0x120] sm:$0xff]  ;;  %v253_v56 = vld [vmem:[#allocation4 + $0x128] sm:$0xff] }
  0x23   :  { %699 = vmatpush3.bf16.msra.mxu0 %v698_v32  ;;  %721 = vmatprep.subr.bf16.mxu1 %v720_v44  ;;  %v108_v57 = vld [vmem:[#allocation4 + $0xe0] sm:$0xff]  ;;  %v109_v58 = vld [vmem:[#allocation4 + $0xe8] sm:$0xff]  ;;  %v706_v60 = vpack.c.bf16 %v91_v53, %v90_v50  ;;  %v726_v61 = vpack.c.bf16 %v253_v56, %v252_v55  ;;  %v110_v2 = vld [vmem:[#allocation4 + $0xf0] sm:$0xff] }
  0x24   :  { %701 = vmatprep.subr.bf16.mxu0 %v700_v38  ;;  %v74_v59 = vld [vmem:[#allocation2 + $0x8] sm:$0xff]  ;;  %v708_v62 = vpack.c.bf16 %v109_v58, %v108_v57  ;;  %v92_v63 = vld [vmem:[#allocation4 + $0x60] sm:$0xff]  ;;  %v111_v3 = vld [vmem:[#allocation4 + $0xf8] sm:$0xff] }
  0x25   :  { %183 = vmatprep.mubr.f32.mxu0 %v74_v59  ;;  %v93_v1 = vld [vmem:[#allocation4 + $0x68] sm:$0xff]  ;;  %v712_v5 = vpack.c.bf16 %v111_v3, %v110_v2  ;;  %v94_v6 = vld [vmem:[#allocation4 + $0x70] sm:$0xff]  ;;  %v95_v7 = vld [vmem:[#allocation4 + $0x78] sm:$0xff] }
  0x26   :  { %723 = vmatpush3.bf16.msra.mxu1 %v722_v51  ;;  %v710_v4 = vpack.c.bf16 %v93_v1, %v92_v63  ;;  %v714_v8 = vpack.c.bf16 %v95_v7, %v94_v6  ;;  %v68_v9 = vld [vmem:[#allocation2 + $0x7] sm:$0xff]  ;;  %v75_v10 = vld [vmem:[#allocation2 + $0x10] sm:$0xff]  ;;  %v78_v15 = vld [vmem:[#allocation2 + $0x38] sm:$0xff]  ;;  %v64_v51 = vlaneseq }
  0x27   :  { %703 = vmatpush3.bf16.msra.mxu0 %v702_v49  ;;  %725 = vmatprep.subr.bf16.mxu1 %v724_v54  ;;  %v69_v11 = vld [vmem:[#allocation2 + $0xf] sm:$0xff]  ;;  %v70_v12 = vld [vmem:[#allocation2 + $0x17] sm:$0xff]  ;;  %v73_v17 = vld [vmem:[#allocation2 + $0x3f] sm:$0xff] }
  0x28   :  { %705 = vmatprep.subr.bf16.mxu0 %v704_v52  ;;  %v77_v13 = vld [vmem:[#allocation2 + $0x30] sm:$0xff]  ;;  %v271_v19 = vld [vmem:[#allocation4 + $0x1b8] sm:$0xff]  ;;  %v272_v24 = vld [vmem:[#allocation4 + $0x1c0] sm:$0xff]  ;;  %v65_v56 = vshrl.u32 %v64_v51, 7 }
  0x29   :  { %v71_v14 = vld [vmem:[#allocation2 + $0x2f] sm:$0xff]  ;;  %v72_v16 = vld [vmem:[#allocation2 + $0x37] sm:$0xff]  ;;  %v256_v27 = vld [vmem:[#allocation4 + $0x140] sm:$0xff] }
  0x2a   :  { %727 = vmatpush3.bf16.msra.mxu1 %v726_v61  ;;  %v270_v18 = vld [vmem:[#allocation4 + $0x1b0] sm:$0xff]  ;;  %v255_v22 = vld [vmem:[#allocation4 + $0x138] sm:$0xff]  ;;  %v273_v25 = vld [vmem:[#allocation4 + $0x1c8] sm:$0xff]  ;;  %v909_v61 = vadd.s32 16, %v65_v56 }
  0x2b   :  { %707 = vmatpush3.bf16.msra.mxu0 %v706_v60  ;;  %v728_v20 = vpack.c.bf16 %v271_v19, %v270_v18  ;;  %v254_v21 = vld [vmem:[#allocation4 + $0x130] sm:$0xff]  ;;  %v732_v26 = vpack.c.bf16 %v273_v25, %v272_v24  ;;  %v257_v28 = vld [vmem:[#allocation4 + $0x148] sm:$0xff]  ;;  %v275_v31 = vld [vmem:[#allocation4 + $0x1d8] sm:$0xff] }
  0x2c   :  { %709 = vmatprep.subr.bf16.mxu0 %v708_v62  ;;  %v730_v23 = vpack.c.bf16 %v255_v22, %v254_v21  ;;  %v734_v29 = vpack.c.bf16 %v257_v28, %v256_v27  ;;  %v274_v30 = vld [vmem:[#allocation4 + $0x1d0] sm:$0xff]  ;;  %v259_v34 = vld [vmem:[#allocation4 + $0x158] sm:$0xff]  ;;  %v276_v36 = vld [vmem:[#allocation4 + $0x1e0] sm:$0xff]  ;;  %vm222_vm1 = vcmp.lt.s32.totalorder %v909_v61, 17 }
  0x2d   :  { %729 = vmatprep.subr.bf16.mxu1 %v728_v20  ;;  %v736_v32 = vpack.c.bf16 %v275_v31, %v274_v30  ;;  %v258_v33 = vld [vmem:[#allocation4 + $0x150] sm:$0xff]  ;;  %v277_v37 = vld [vmem:[#allocation4 + $0x1e8] sm:$0xff]  ;;  %v260_v39 = vld [vmem:[#allocation4 + $0x160] sm:$0xff] }
  0x2e   :  { %731 = vmatpush3.bf16.msra.mxu1 %v730_v23  ;;  %v738_v35 = vpack.c.bf16 %v259_v34, %v258_v33  ;;  %v740_v38 = vpack.c.bf16 %v277_v37, %v276_v36  ;;  %v261_v40 = vld [vmem:[#allocation4 + $0x168] sm:$0xff]  ;;  %v278_v42 = vld [vmem:[#allocation4 + $0x1f0] sm:$0xff]  ;;  %v279_v43 = vld [vmem:[#allocation4 + $0x1f8] sm:$0xff]  ;;  %v831_v36 = vmov 0.0|0.0  }
  0x2f   :  { %711 = vmatpush3.bf16.msra.mxu0 %v710_v4  ;;  %733 = vmatprep.subr.bf16.mxu1 %v732_v26  ;;  %v742_v41 = vpack.c.bf16 %v261_v40, %v260_v39  ;;  %v744_v44 = vpack.c.bf16 %v279_v43, %v278_v42  ;;  %v262_v45 = vld [vmem:[#allocation4 + $0x170] sm:$0xff]  ;;  %v263_v46 = vld [vmem:[#allocation4 + $0x178] sm:$0xff]  ;;  %v528_v49 = vld [vmem:[%s989_s2] ss:$0 sm:$0xff] }
  0x30   :  { %713 = vmatprep.subr.bf16.mxu0 %v712_v5  ;;  %v746_v47 = vpack.c.bf16 %v263_v46, %v262_v45  ;;  %v413_v33 = vld [vmem:[%s990_s3] sm:$0xff]  ;;  %v414_v34 = vld [vmem:[%s990_s3 + $0x8] sm:$0xff]  ;;  %v415_v37 = vld [vmem:[%s990_s3 + $0x10] sm:$0xff] }
  0x31   :  { %v417_v40 = vld [vmem:[%s990_s3 + $0x20] sm:$0xff]  ;;  %v419_v43 = vld [vmem:[%s990_s3 + $0x30] sm:$0xff]  ;;  %v428_v56 = vld [vmem:[%s990_s3 + $0x78] sm:$0xff] }
  0x32   :  { %735 = vmatpush3.bf16.msra.mxu1 %v734_v29  ;;  %v421_v46 = vld [vmem:[%s990_s3 + $0x40] sm:$0xff] }
  0x33   :  { %715 = vmatpush3.bf16.msra.mxu0 %v714_v8  ;;  %737 = vmatprep.subr.bf16.mxu1 %v736_v32  ;;  %v531_v61 = vld [vmem:[%s991_s4] ss:$0 sm:$0xff] }
  0x34   :  { %748 = vmatprep.subr.bf16.mxu0 %v831_v36 }
  0x36   :  { %184 = vmatmul.mubr.f32.vlgmr.msra.gmra.mrb[0].mxu0 %v68_v9  ;;  %739 = vmatpush3.bf16.msra.mxu1 %v738_v35  ;;  %v749_v35 = vpack.c.bf16 %v414_v34, %v413_v33 }
  0x37   :  { %188 = vmatprep.mubr.f32.mxu0 %v75_v10  ;;  %741 = vmatprep.subr.bf16.mxu1 %v740_v38  ;;  %v416_v38 = vld [vmem:[%s990_s3 + $0x18] sm:$0xff] }
  0x38   :  { %750 = vmatpush3.bf16.msra.mxu0 %v749_v35  ;;  %v752_v39 = vpack.c.bf16 %v416_v38, %v415_v37 }
  0x39   :  { %751 = vmatprep.subr.bf16.mxu0 %v831_v36 }
  0x3a   :  { %189 = vmatmul.mubr.f32.gmra.mrb[2].mxu0 %v69_v11  ;;  %743 = vmatpush3.bf16.msra.mxu1 %v742_v41  ;;  %v418_v41 = vld [vmem:[%s990_s3 + $0x28] sm:$0xff] }
  0x3b   :  { %193 = vmatprep.mubr.f32.mxu0 %v830_v0  ;;  %745 = vmatprep.subr.bf16.mxu1 %v744_v44  ;;  %v755_v42 = vpack.c.bf16 %v418_v41, %v417_v40  ;;  %v420_v44 = vld [vmem:[%s990_s3 + $0x38] sm:$0xff] }
  0x3c   :  { %753 = vmatpush3.bf16.msra.mxu0 %v752_v39  ;;  %v758_v45 = vpack.c.bf16 %v420_v44, %v419_v43 }
  0x3d   :  { %754 = vmatprep.subr.bf16.mxu0 %v831_v36 }
  0x3e   :  { %194 = vmatmul.mubr.f32.gmra.mrb[4].mxu0 %v70_v12  ;;  %747 = vmatpush3.bf16.msra.mxu1 %v746_v47  ;;  %v422_v47 = vld [vmem:[%s990_s3 + $0x48] sm:$0xff] }
  0x3f   :  { %198 = vmatprep.mubr.f32.mxu0 %v77_v13 }
  0x40   :  { %756 = vmatpush3.bf16.msra.mxu0 %v755_v42 }
  0x41   :  { %757 = vmatprep.subr.bf16.mxu0 %v831_v36 }
  0x42   :  { %199 = vmatmul.mubr.f32.gmra.mrb[6].mxu0 %v71_v14 }
  0x43   :  { %203 = vmatprep.mubr.f32.mxu0 %v78_v15 }
  0x44   :  { %759 = vmatpush3.bf16.msra.mxu0 %v758_v45 }
  0x45   :  { %760 = vmatprep.subr.bf16.mxu0 %v831_v36 }
  0x46   :  { %204 = vmatmul.mubr.f32.gmra.mrb[8].mxu0 %v72_v16 }
  0x47   :  { %208 = vmatprep.mubr.f32.mxu0 %v830_v0 }
  0x4a   :  { %209 = vmatmul.mubr.f32.gmra.mrb[10].mxu0 %v73_v17 }
  0x4b   :  { %681 = vmatprep.mubr.msk.f32.mxu0 %vm832_vm2, %v830_v0 }
 0x109   :  { %v564_v48 = vpop.f32.mrb[0].mxu0 }
 0x10a   :  { %v565_v50 = vpop.f32.mrb[1].mxu0 }
 0x10b   :  { %v566_v52 = vadd.f32 %v565_v50, %v564_v48  ;;  %v761_v48 = vpack.c.bf16 %v422_v47, %v421_v46  ;;  %v424_v50 = vld [vmem:[%s990_s3 + $0x58] sm:$0xff] }
 0x10d   :  { %v186_v53 = vadd.f32 %v566_v52, %v528_v49  ;;  %v567_v54 = vpop.f32.mrb[2].mxu0  ;;  %762 = vmatpush3.bf16.msra.mxu0 %v761_v48  ;;  %v425_v52 = vld [vmem:[%s990_s3 + $0x60] sm:$0xff] }
 0x10e   :  { %v568_v55 = vpop.f32.mrb[3].mxu0  ;;  %763 = vmatprep.subr.bf16.mxu0 %v831_v36 }
 0x10f   :  { %v214_v57 = vmax.f32 %v186_v53, 0.0  ;;  %v569_v58 = vadd.f32 %v568_v55, %v567_v54  ;;  %v426_v53 = vld [vmem:[%s990_s3 + $0x68] sm:$0xff]  ;;  %v427_v55 = vld [vmem:[%s990_s3 + $0x70] sm:$0xff] }
 0x110   :  { %v767_v54 = vpack.c.bf16 %v426_v53, %v425_v52 }
 0x111   :  { %229 = vst [vmem:[#allocation3 + $0x8] sm:$0xff] %v214_v57  ;;  %v191_v59 = vadd.f32 %v569_v58, %v528_v49  ;;  %v570_v60 = vpop.f32.mrb[4].mxu0  ;;  %v770_v57 = vpack.c.bf16 %v428_v56, %v427_v55 }
 0x112   :  { %v571_v62 = vpop.f32.mrb[5].mxu0 }
 0x113   :  { %v215_v63 = vmax.f32 %v191_v59, 0.0  ;;  %v572_v1 = vadd.f32 %v571_v62, %v570_v60  ;;  %v530_v62 = vld [vmem:[%s989_s2 + $0x1] ss:$0 sm:$0xff] }
 0x115   :  { %230 = vst [vmem:[#allocation3 + $0x10] sm:$0xff] %v215_v63  ;;  %v196_v2 = vadd.f32 %v572_v1, %v528_v49  ;;  %v573_v3 = vpop.f32.mrb[6].mxu0 }
 0x116   :  { %v574_v4 = vpop.f32.mrb[7].mxu0 }
 0x117   :  { %v216_v5 = vmax.f32 %v196_v2, 0.0  ;;  %v575_v6 = vadd.f32 %v574_v4, %v573_v3 }
 0x118   :  { %v235_v16 = vld [vmem:[#allocation3 + $0x7] sm:$0xff] }
 0x119   :  { %v225_v7 = vsel %vm222_vm1, %v216_v5, 0.0  ;;  %v201_v8 = vadd.f32 %v575_v6, %v528_v49  ;;  %v576_v9 = vpop.f32.mrb[8].mxu0 }
 0x11a   :  { %231 = vst [vmem:[#allocation3 + $0x18] sm:$0xff] %v225_v7  ;;  %v577_v10 = vpop.f32.mrb[9].mxu0 }
 0x11b   :  { %v217_v11 = vmax.f32 %v201_v8, 0.0  ;;  %v578_v12 = vadd.f32 %v577_v10, %v576_v9 }
 0x11c   :  { %v241_v13 = vld [vmem:[#allocation3 + $0x9] sm:$0xff] }
 0x11d   :  { %232 = vst [vmem:[#allocation3 + $0x30] sm:$0xff] %v217_v11  ;;  %v206_v14 = vadd.f32 %v578_v12, %v528_v49  ;;  %v579_v15 = vpop.f32.mrb[10].mxu0  ;;  %352 = vmatprep.mubr.f32.mxu1 %v241_v13  ;;  %v236_v22 = vld [vmem:[#allocation3 + $0xf] sm:$0xff] }
 0x11e   :  { %v580_v17 = vpop.f32.mrb[11].mxu0  ;;  %353 = vmatmul.mubr.f32.vlgmr.msra.gmra.mrb[0].mxu1 %v235_v16 }
 0x11f   :  { %v218_v18 = vmax.f32 %v206_v14, 0.0  ;;  %v581_v19 = vadd.f32 %v580_v17, %v579_v15 }
 0x121   :  { %233 = vst [vmem:[#allocation3 + $0x38] sm:$0xff] %v218_v18  ;;  %v211_v20 = vadd.f32 %v581_v19, %v528_v49  ;;  %v242_v21 = vld [vmem:[#allocation3 + $0x11] sm:$0xff]  ;;  %v243_v24 = vld [vmem:[#allocation3 + $0x19] sm:$0xff] }
 0x122   :  { %357 = vmatprep.mubr.f32.mxu1 %v242_v21  ;;  %v237_v26 = vld [vmem:[#allocation3 + $0x17] sm:$0xff]  ;;  %v423_v49 = vld [vmem:[%s990_s3 + $0x50] sm:$0xff] }
 0x123   :  { %v219_v23 = vmax.f32 %v211_v20, 0.0  ;;  %358 = vmatmul.mubr.f32.gmra.mrb[2].mxu1 %v236_v22  ;;  %v764_v51 = vpack.c.bf16 %v424_v50, %v423_v49 }
 0x124   :  { %362 = vmatprep.mubr.f32.mxu1 %v243_v24  ;;  %v238_v28 = vld [vmem:[#allocation3 + $0x2f] sm:$0xff] }
 0x125   :  { %v228_v25 = vsel %vm222_vm1, %v219_v23, 0.0  ;;  %765 = vmatpush3.bf16.msra.mxu0 %v764_v51 }
 0x126   :  { %234 = vst [vmem:[#allocation3 + $0x40] sm:$0xff] %v228_v25  ;;  %766 = vmatprep.subr.bf16.mxu0 %v831_v36 }
 0x127   :  { %363 = vmatmul.mubr.f32.gmra.mrb[4].mxu1 %v237_v26 }
 0x128   :  { %v244_v27 = vld [vmem:[#allocation3 + $0x31] sm:$0xff] }
 0x129   :  { %367 = vmatprep.mubr.f32.mxu1 %v244_v27  ;;  %v239_v30 = vld [vmem:[#allocation3 + $0x37] sm:$0xff]  ;;  %768 = vmatpush3.bf16.msra.mxu0 %v767_v54 }
 0x12a   :  { %769 = vmatprep.subr.bf16.mxu0 %v831_v36 }
 0x12b   :  { %368 = vmatmul.mubr.f32.gmra.mrb[6].mxu1 %v238_v28 }
 0x12d   :  { %v245_v29 = vld [vmem:[#allocation3 + $0x39] sm:$0xff]  ;;  %v246_v31 = vld [vmem:[#allocation3 + $0x41] sm:$0xff]  ;;  %771 = vmatpush3.bf16.msra.mxu0 %v770_v57 }
 0x12e   :  { %372 = vmatprep.mubr.f32.mxu1 %v245_v29  ;;  %v240_v32 = vld [vmem:[#allocation3 + $0x3f] sm:$0xff] }
 0x12f   :  { %373 = vmatmul.mubr.f32.gmra.mrb[8].mxu1 %v239_v30 }
 0x130   :  { %377 = vmatprep.mubr.f32.mxu1 %v246_v31 }
 0x133   :  { %378 = vmatmul.mubr.f32.gmra.mrb[10].mxu1 %v240_v32 }
 0x1f1   :  { %v614_v58 = vpop.f32.mrb[0].mxu1 }
 0x1f2   :  { %v615_v59 = vpop.f32.mrb[1].mxu1 }
 0x1f3   :  { %v616_v60 = vadd.f32 %v615_v59, %v614_v58 }
 0x1f5   :  { %v355_v2 = vadd.f32 %v616_v60, %v530_v62 }
 0x1f6   :  { %v617_v63 = vpop.f32.mrb[2].mxu1 }
 0x1f7   :  { %v618_v1 = vpop.f32.mrb[3].mxu1  ;;  %v383_v7 = vmax.f32 %v355_v2, 0.0 }
 0x1f8   :  { %v619_v3 = vadd.f32 %v618_v1, %v617_v63 }
 0x1fa   :  { %v360_v4 = vadd.f32 %v619_v3, %v530_v62  ;;  %v620_v5 = vpop.f32.mrb[4].mxu1 }
 0x1fb   :  { %v621_v6 = vpop.f32.mrb[5].mxu1 }
 0x1fc   :  { %v384_v8 = vmax.f32 %v360_v4, 0.0  ;;  %v622_v9 = vadd.f32 %v621_v6, %v620_v5 }
 0x1fe   :  { %v395_v10 = vadd.f32 %v384_v8, %v383_v7  ;;  %v365_v0 = vadd.f32 %v622_v9, %v530_v62  ;;  %v623_v11 = vpop.f32.mrb[6].mxu1 }
 0x1ff   :  { %v624_v12 = vpop.f32.mrb[7].mxu1 }
 0x200   :  { %v385_v13 = vmax.f32 %v365_v0, 0.0  ;;  %v625_v14 = vadd.f32 %v624_v12, %v623_v11 }
 0x202   :  { %v391_v15 = vsel %vm222_vm1, %v385_v13, 0.0  ;;  %v626_v16 = vpop.f32.mrb[8].mxu1  ;;  %v370_v19 = vadd.f32 %v625_v14, %v530_v62 }
 0x203   :  { %v396_v17 = vadd.f32 %v395_v10, %v391_v15  ;;  %v627_v18 = vpop.f32.mrb[9].mxu1 }
 0x204   :  { %v628_v20 = vadd.f32 %v627_v18, %v626_v16  ;;  %v386_v25 = vmax.f32 %v370_v19, 0.0 }
 0x205   :  { %v397_v21 = vrot.slane %v396_v17, 4 }
 0x206   :  { %v375_v22 = vadd.f32 %v628_v20, %v530_v62  ;;  %v629_v23 = vpop.f32.mrb[10].mxu1 }
 0x207   :  { %v630_v24 = vpop.f32.mrb[11].mxu1  ;;  %v398_v28 = vadd.f32 %v397_v21, %v396_v17 }
 0x208   :  { %v387_v26 = vmax.f32 %v375_v22, 0.0  ;;  %v631_v27 = vadd.f32 %v630_v24, %v629_v23 }
 0x209   :  { %v399_v32 = vrot.slane %v398_v28, 2 }
 0x20a   :  { %v403_v29 = vadd.f32 %v387_v26, %v386_v25  ;;  %v380_v30 = vadd.f32 %v631_v27, %v530_v62 }
 0x20b   :  { %v400_v35 = vadd.f32 %v399_v32, %v398_v28 }
 0x20c   :  { %v388_v31 = vmax.f32 %v380_v30, 0.0 }
 0x20d   :  { %v401_v38 = vrot.slane %v400_v35, 1 }
 0x20e   :  { %v394_v33 = vsel %vm222_vm1, %v388_v31, 0.0 }
 0x20f   :  { %v404_v34 = vadd.f32 %v403_v29, %v394_v33  ;;  %v402_v42 = vadd.f32 %v401_v38, %v400_v35 }
 0x211   :  { %v405_v36 = vrot.slane %v404_v34, 4  ;;  %v411_v44 = vmul.f32 0.05882353, %v402_v42 }
 0x213   :  { %v406_v37 = vadd.f32 %v405_v36, %v404_v34 }
 0x215   :  { %v407_v39 = vrot.slane %v406_v37, 2 }
 0x217   :  { %v408_v40 = vadd.f32 %v407_v39, %v406_v37 }
 0x219   :  { %v409_v41 = vrot.slane %v408_v40, 1 }
 0x21b   :  { %v410_v43 = vadd.f32 %v409_v41, %v408_v40 }
 0x21d   :  { %v412_v45 = vmul.f32 0.05882353, %v410_v43 }
 0x21f   :  { %v439_v46 = vsel %vm438_vm3, %v412_v45, %v411_v44 }
 0x220   :  { %682 = vmatmul.mubr.f32.vlgmr.msra.gmra.mrb[12].mxu0 %v439_v46 }
 0x2f3   :  { %v507_v47 = vpop.f32.mrb[12].mxu0 }
 0x2f4   :  { %v508_v48 = vadd.f32 %v531_v61, %v507_v47  ;;  %v683_v49 = vpop.f32.mrb[13].mxu0 }
 0x2f6   :  { %512 = vst.msk [vmem:[#allocation7] sm:$0x3] %vm511_vm4, %v508_v48 }
 0x2f7   :  { %812 = shalt.err (!%p809_p12)
}
 0x2f8   :  { %s813_s27 = scalar_lea.hbm %s992_s5, 32 }
 0x2f9   :  { %p814_p13 = scmp.ne.s32.totalorder %s992_s5, %s813_s27  ;;  %p817_p0 = scmp.lt.u32.totalorder %s813_s27, %s992_s5 }
 0x2fb   :  { %p819_p1 = pnand %p817_p0, %p814_p13 }
 0x2fd   :  { %822 = shalt.err (!%p819_p1)
}
 0x2fe   :  { %522 = dma.vmem_to_hbm [thread:$0]  %s520_s23, 32, %s992_s5, [#allocation6]  }
 0x2ff   :  { %825 = dma.done.wait [#allocation6], 32  }
 0x300   :  { %826 = vsyncadd [#allocation6], 4294967264 }
 0x301   :  { %526 = vsyncpa [#allocation5], 1 }
 0x302   :  { %527 = vsyncpa [#allocation6], 1 }

</bundles_post_ra>
